<compile_context>
chip_gen: v7x
topology: tpu7x:2x2x1
jax: 0.10.0
libtpu: 0.0.40
codegen_flags: <defaults>
</compile_context>

<pallas_src>
import functools

import jax
import jax.numpy as jnp
from jax.experimental import pallas as pl
from jax.experimental.pallas import tpu as pltpu


def _critic_kernel(s_ref, a_ref,
                   w1s_ref, w1a_ref, b1_ref,
                   w2_ref, b2_ref,
                   w3_ref, b3_ref,
                   out_ref):
    # fc1 + ReLU, with the concat folded into two dots (s @ w1_s + a @ w1_a).
    h1 = jnp.dot(s_ref[...], w1s_ref[...], preferred_element_type=jnp.float32)
    h1 = h1 + jnp.dot(a_ref[...], w1a_ref[...], preferred_element_type=jnp.float32)
    h1 = jnp.maximum(h1 + b1_ref[...], 0.0)

    # fc2 + ReLU (MXU).
    h2 = jnp.dot(h1, w2_ref[...], preferred_element_type=jnp.float32) + b2_ref[...]
    h2 = jnp.maximum(h2, 0.0)

    # fc3: single output column -> VPU multiply + cross-lane reduce (XLU),
    # cheaper than pushing an N=1 matmul through the MXU.
    q = jnp.sum(h2 * w3_ref[...], axis=-1, keepdims=True) + b3_ref[...]
    out_ref[...] = q.astype(out_ref.dtype)


@functools.partial(jax.jit, static_argnames=("block_b",))
def critic_forward(states, actions, params, block_b=512):
    """Runs the critic MLP with a Pallas kernel, tiled over the batch dimension.

    block_b: requested rows per grid step (rounded to a multiple of 8 and
    clamped to the padded batch).  Larger tiles amortize the ~0.35 us per-step
    pipeline overhead; tiny batches collapse to a single grid step.
    """
    w1, b1, w2, b2, w3, b3 = params
    B, S = states.shape
    A = actions.shape[1]
    H = w1.shape[1]          # 64
    O = w3.shape[1]          # 1

    # Split fc1 weight so the kernel never concatenates along the lane axis.
    w1_s = w1[:S]            # (S, H)
    w1_a = w1[S:]            # (A, H)
    w3_row = w3.T            # (1, H) for VPU broadcast-multiply + lane reduce

    # Batch tile: multiple of 8 (f32 sublane granularity), no larger than the
    # (padded) batch itself.
    bb = max(8, (int(block_b) // 8) * 8)
    bb = min(bb, ((B + 7) // 8) * 8)
    B_pad = ((B + bb - 1) // bb) * bb
    if B_pad != B:
        states = jnp.pad(states, ((0, B_pad - B), (0, 0)))
        actions = jnp.pad(actions, ((0, B_pad - B), (0, 0)))

    grid = (B_pad // bb,)

    out = pl.pallas_call(
        _critic_kernel,
        out_shape=jax.ShapeDtypeStruct((B_pad, O), jnp.float32),
        grid_spec=pl.GridSpec(
            grid=grid,
            in_specs=[
                # batch-tiled activations
                pl.BlockSpec((bb, S), lambda i: (i, 0)),
                pl.BlockSpec((bb, A), lambda i: (i, 0)),
                # weights / biases: constant block -> DMA'd once, VMEM-resident
                pl.BlockSpec((S, H), lambda i: (0, 0)),
                pl.BlockSpec((A, H), lambda i: (0, 0)),
                pl.BlockSpec((1, H), lambda i: (0, 0)),
                pl.BlockSpec((H, H), lambda i: (0, 0)),
                pl.BlockSpec((1, H), lambda i: (0, 0)),
                pl.BlockSpec((1, H), lambda i: (0, 0)),   # w3 as a row
                pl.BlockSpec((1, O), lambda i: (0, 0)),
            ],
            out_specs=pl.BlockSpec((bb, O), lambda i: (i, 0)),
        ),
        compiler_params=pltpu.CompilerParams(
            dimension_semantics=("parallel",)),
    )(states, actions, w1_s, w1_a, b1, w2, b2, w3_row, b3)

    return out[:B]


def init_params(key, state_shape, num_actions, hidden=64):
    """Deterministic parameter init mirroring the PyTorch module:
    weights ~ N(0, 0.1) (initialize_weight); biases keep nn.Linear's default
    U(-1/sqrt(fan_in), 1/sqrt(fan_in))."""
    in1 = state_shape + num_actions
    k = jax.random.split(key, 6)
    # Stored pre-transposed as [in, out].
    w1 = 0.1 * jax.random.normal(k[0], (in1, hidden), jnp.float32)
    w2 = 0.1 * jax.random.normal(k[1], (hidden, hidden), jnp.float32)
    w3 = 0.1 * jax.random.normal(k[2], (hidden, 1), jnp.float32)
    b1 = jax.random.uniform(k[3], (1, hidden), jnp.float32,
                            -1.0 / jnp.sqrt(in1), 1.0 / jnp.sqrt(in1))
    b2 = jax.random.uniform(k[4], (1, hidden), jnp.float32,
                            -1.0 / jnp.sqrt(hidden), 1.0 / jnp.sqrt(hidden))
    b3 = jax.random.uniform(k[5], (1, 1), jnp.float32,
                            -1.0 / jnp.sqrt(hidden), 1.0 / jnp.sqrt(hidden))
    return (w1, b1, w2, b2, w3, b3)


def reference_forward(states, actions, params):
    w1, b1, w2, b2, w3, b3 = params
    x = jnp.concatenate([states, actions], axis=1)
    x = jnp.maximum(x @ w1 + b1, 0.0)
    x = jnp.maximum(x @ w2 + b2, 0.0)
    return x @ w3 + b3


if __name__ == "__main__":
    key = jax.random.PRNGKey(0)
    state_shape = 8
    num_actions = 4
    batch = 2

    kp, ks, ka = jax.random.split(key, 3)
    params = init_params(kp, state_shape, num_actions)
    states = jax.random.normal(ks, (batch, state_shape), jnp.float32)
    actions = jax.random.normal(ka, (batch, num_actions), jnp.float32)

    out = critic_forward(states, actions, params)
    out = jax.block_until_ready(out)

    ref = reference_forward(states, actions, params)
    assert out.shape == (batch, 1), out.shape
    assert jnp.allclose(out, ref, atol=1e-5, rtol=1e-5), (out, ref)

    # Also exercise a larger, multi-grid-step batch to validate the tiled path.
    kb = jax.random.PRNGKey(1)
    ks2, ka2 = jax.random.split(kb)
    big_states = jax.random.normal(ks2, (1000, state_shape), jnp.float32)
    big_actions = jax.random.normal(ka2, (1000, num_actions), jnp.float32)
    big_out = jax.block_until_ready(critic_forward(big_states, big_actions, params))
    big_ref = reference_forward(big_states, big_actions, params)
    assert big_out.shape == (1000, 1), big_out.shape
    assert jnp.allclose(big_out, big_ref, atol=1e-4, rtol=1e-4)

    print("KERNEL_OK")
</pallas_src>

<mosaic_0001>
module attributes {stable_mosaic.version = 11 : i64} {
  func.func @_critic_kernel(%arg0: i32, %arg1: memref<8x8xf32, #tpu.memory_space<vmem>>, %arg2: memref<8x4xf32, #tpu.memory_space<vmem>>, %arg3: memref<8x64xf32, #tpu.memory_space<vmem>>, %arg4: memref<4x64xf32, #tpu.memory_space<vmem>>, %arg5: memref<1x64xf32, #tpu.memory_space<vmem>>, %arg6: memref<64x64xf32, #tpu.memory_space<vmem>>, %arg7: memref<1x64xf32, #tpu.memory_space<vmem>>, %arg8: memref<1x64xf32, #tpu.memory_space<vmem>>, %arg9: memref<1x1xf32, #tpu.memory_space<vmem>>, %arg10: memref<8x1xf32, #tpu.memory_space<vmem>>) attributes {dimension_semantics = [#tpu.dimension_semantics<parallel>], iteration_bounds = array<i64: 1>, scalar_prefetch = 0 : i64, scratch_operands = 0 : i64, tpu.core_type = #tpu.core_type<tc>, window_params = [{transform_indices = @transform_0, window_bounds = array<i64: 8, 8>}, {transform_indices = @transform_1, window_bounds = array<i64: 8, 4>}, {pipeline_mode = #tpu.pipeline_mode<synchronous>, transform_indices = @transform_2, window_bounds = array<i64: 8, 64>}, {pipeline_mode = #tpu.pipeline_mode<synchronous>, transform_indices = @transform_3, window_bounds = array<i64: 4, 64>}, {pipeline_mode = #tpu.pipeline_mode<synchronous>, transform_indices = @transform_4, window_bounds = array<i64: 1, 64>}, {pipeline_mode = #tpu.pipeline_mode<synchronous>, transform_indices = @transform_5, window_bounds = array<i64: 64, 64>}, {pipeline_mode = #tpu.pipeline_mode<synchronous>, transform_indices = @transform_6, window_bounds = array<i64: 1, 64>}, {pipeline_mode = #tpu.pipeline_mode<synchronous>, transform_indices = @transform_7, window_bounds = array<i64: 1, 64>}, {pipeline_mode = #tpu.pipeline_mode<synchronous>, transform_indices = @transform_8, window_bounds = array<i64: 1, 1>}, {transform_indices = @transform_9, window_bounds = array<i64: 8, 1>}]} {
    %c0 = arith.constant 0 : index
    %c0_0 = arith.constant 0 : index
    %0 = vector.load %arg1[%c0, %c0_0] : memref<8x8xf32, #tpu.memory_space<vmem>>, vector<8x8xf32>
    %c0_1 = arith.constant 0 : index
    %c0_2 = arith.constant 0 : index
    %1 = vector.load %arg3[%c0_1, %c0_2] : memref<8x64xf32, #tpu.memory_space<vmem>>, vector<8x64xf32>
    %cst = arith.constant dense<0.000000e+00> : vector<8x64xf32>
    %2 = tpu.matmul %0, %1, %cst {dimension_numbers = #tpu.dot_dimension_numbers<[1], [0], [0], [1], [0, 0, 1, 1], [], []>} : vector<8x8xf32>, vector<8x64xf32>, vector<8x64xf32> -> vector<8x64xf32>
    %c0_3 = arith.constant 0 : index
    %c0_4 = arith.constant 0 : index
    %3 = vector.load %arg2[%c0_3, %c0_4] : memref<8x4xf32, #tpu.memory_space<vmem>>, vector<8x4xf32>
    %c0_5 = arith.constant 0 : index
    %c0_6 = arith.constant 0 : index
    %4 = vector.load %arg4[%c0_5, %c0_6] : memref<4x64xf32, #tpu.memory_space<vmem>>, vector<4x64xf32>
    %cst_7 = arith.constant dense<0.000000e+00> : vector<8x64xf32>
    %5 = tpu.matmul %3, %4, %cst_7 {dimension_numbers = #tpu.dot_dimension_numbers<[1], [0], [0], [1], [0, 0, 1, 1], [], []>} : vector<8x4xf32>, vector<4x64xf32>, vector<8x64xf32> -> vector<8x64xf32>
    %6 = arith.addf %2, %5 : vector<8x64xf32>
    %c0_8 = arith.constant 0 : index
    %c0_9 = arith.constant 0 : index
    %7 = vector.load %arg5[%c0_8, %c0_9] : memref<1x64xf32, #tpu.memory_space<vmem>>, vector<1x64xf32>
    %8 = vector.broadcast %7 : vector<1x64xf32> to vector<8x64xf32>
    %9 = arith.addf %6, %8 : vector<8x64xf32>
    %cst_10 = arith.constant 0.000000e+00 : f32
    %10 = vector.broadcast %cst_10 : f32 to vector<8x64xf32>
    %11 = arith.maximumf %9, %10 : vector<8x64xf32>
    %c0_11 = arith.constant 0 : index
    %c0_12 = arith.constant 0 : index
    %12 = vector.load %arg6[%c0_11, %c0_12] : memref<64x64xf32, #tpu.memory_space<vmem>>, vector<64x64xf32>
    %cst_13 = arith.constant dense<0.000000e+00> : vector<8x64xf32>
    %13 = tpu.matmul %11, %12, %cst_13 {dimension_numbers = #tpu.dot_dimension_numbers<[1], [0], [0], [1], [0, 0, 1, 1], [], []>} : vector<8x64xf32>, vector<64x64xf32>, vector<8x64xf32> -> vector<8x64xf32>
    %c0_14 = arith.constant 0 : index
    %c0_15 = arith.constant 0 : index
    %14 = vector.load %arg7[%c0_14, %c0_15] : memref<1x64xf32, #tpu.memory_space<vmem>>, vector<1x64xf32>
    %15 = vector.broadcast %14 : vector<1x64xf32> to vector<8x64xf32>
    %16 = arith.addf %13, %15 : vector<8x64xf32>
    %cst_16 = arith.constant 0.000000e+00 : f32
    %17 = vector.broadcast %cst_16 : f32 to vector<8x64xf32>
    %18 = arith.maximumf %16, %17 : vector<8x64xf32>
    %c0_17 = arith.constant 0 : index
    %c0_18 = arith.constant 0 : index
    %19 = vector.load %arg8[%c0_17, %c0_18] : memref<1x64xf32, #tpu.memory_space<vmem>>, vector<1x64xf32>
    %20 = vector.broadcast %19 : vector<1x64xf32> to vector<8x64xf32>
    %21 = arith.mulf %18, %20 : vector<8x64xf32>
    %cst_19 = arith.constant dense<0.000000e+00> : vector<8xf32>
    %22 = vector.multi_reduction <add>, %21, %cst_19 [1] : vector<8x64xf32> to vector<8xf32>
    %23 = vector.shape_cast %22 : vector<8xf32> to vector<8x1xf32>
    %c0_20 = arith.constant 0 : index
    %c0_21 = arith.constant 0 : index
    %24 = vector.load %arg9[%c0_20, %c0_21] : memref<1x1xf32, #tpu.memory_space<vmem>>, vector<1x1xf32>
    %25 = vector.broadcast %24 : vector<1x1xf32> to vector<8x1xf32>
    %26 = arith.addf %23, %25 : vector<8x1xf32>
    %c0_22 = arith.constant 0 : index
    %c0_23 = arith.constant 0 : index
    %27 = vector.load %arg10[%c0_22, %c0_23] : memref<8x1xf32, #tpu.memory_space<vmem>>, vector<8x1xf32>
    tpu.vector_store %arg10[%c0_22, %c0_23], %26 {strides = array<i32>} : memref<8x1xf32, #tpu.memory_space<vmem>>, vector<8x1xf32>,
    return
  }
  func.func @transform_0(%arg0: i32) -> (i32, i32) {
    %c0_i32 = arith.constant 0 : i32
    %c0_i32_0 = arith.constant 0 : i32
    return %arg0, %c0_i32 : i32, i32
  }
  func.func @transform_1(%arg0: i32) -> (i32, i32) {
    %c0_i32 = arith.constant 0 : i32
    %c0_i32_0 = arith.constant 0 : i32
    return %arg0, %c0_i32 : i32, i32
  }
  func.func @transform_2(%arg0: i32) -> (i32, i32) {
    %c0_i32 = arith.constant 0 : i32
    %c0_i32_0 = arith.constant 0 : i32
    %c0_i32_1 = arith.constant 0 : i32
    return %c0_i32, %c0_i32_0 : i32, i32
  }
  func.func @transform_3(%arg0: i32) -> (i32, i32) {
    %c0_i32 = arith.constant 0 : i32
    %c0_i32_0 = arith.constant 0 : i32
    %c0_i32_1 = arith.constant 0 : i32
    return %c0_i32, %c0_i32_0 : i32, i32
  }
  func.func @transform_4(%arg0: i32) -> (i32, i32) {
    %c0_i32 = arith.constant 0 : i32
    %c0_i32_0 = arith.constant 0 : i32
    %c0_i32_1 = arith.constant 0 : i32
    return %c0_i32, %c0_i32_0 : i32, i32
  }
  func.func @transform_5(%arg0: i32) -> (i32, i32) {
    %c0_i32 = arith.constant 0 : i32
    %c0_i32_0 = arith.constant 0 : i32
    %c0_i32_1 = arith.constant 0 : i32
    return %c0_i32, %c0_i32_0 : i32, i32
  }
  func.func @transform_6(%arg0: i32) -> (i32, i32) {
    %c0_i32 = arith.constant 0 : i32
    %c0_i32_0 = arith.constant 0 : i32
    %c0_i32_1 = arith.constant 0 : i32
    return %c0_i32, %c0_i32_0 : i32, i32
  }
  func.func @transform_7(%arg0: i32) -> (i32, i32) {
    %c0_i32 = arith.constant 0 : i32
    %c0_i32_0 = arith.constant 0 : i32
    %c0_i32_1 = arith.constant 0 : i32
    return %c0_i32, %c0_i32_0 : i32, i32
  }
  func.func @transform_8(%arg0: i32) -> (i32, i32) {
    %c0_i32 = arith.constant 0 : i32
    %c0_i32_0 = arith.constant 0 : i32
    %c0_i32_1 = arith.constant 0 : i32
    return %c0_i32, %c0_i32_0 : i32, i32
  }
  func.func @transform_9(%arg0: i32) -> (i32, i32) {
    %c0_i32 = arith.constant 0 : i32
    %c0_i32_0 = arith.constant 0 : i32
    return %arg0, %c0_i32 : i32, i32
  }
}

</mosaic_0001>

<bundles_post_ra>
// kernel: critic_forward.1
= control target key start
LH: loop header
LB: loop body
LE: loop exit
PB: predicated region body
PF: predicated region fallthrough
CT: control target
= control target key end

     0   :  { %s626_s0 = inlined_call_operand.vmem [shape: f32[8,8], index: 0, kind: input, shape index: {}]   ;;  %s627_s1 = inlined_call_operand.vmem [shape: f32[8,4], index: 1, kind: input, shape index: {}]   ;;  %s628_s2 = inlined_call_operand.vmem [shape: f32[8,64], index: 2, kind: input, shape index: {}]   ;;  %s629_s3 = inlined_call_operand.vmem [shape: f32[4,64], index: 3, kind: input, shape index: {}]   ;;  %s630_s4 = inlined_call_operand.hbm [shape: f32[1,64], index: 4, kind: input, shape index: {}]   ;;  %s631_s5 = inlined_call_operand.vmem [shape: f32[64,64], index: 5, kind: input, shape index: {}]   ;;  %s632_s6 = inlined_call_operand.hbm [shape: f32[1,64], index: 6, kind: input, shape index: {}]   ;;  %s633_s7 = inlined_call_operand.hbm [shape: f32[1,64], index: 7, kind: input, shape index: {}]   ;;  %s634_s8 = inlined_call_operand.<no memory space> [shape: f32[1,1], index: 8, kind: input, shape index: {}]   ;;  %s635_s9 = inlined_call_operand.vmem [shape: f32[8,1], index: 9, kind: output, shape index: {}]  }
   0x1   :  { %v14_v0 = vstv %s634_s8 }
   0x2   :  { %15 = vst [vmem:[#allocation2] sm:$0x1] %v14_v0 }
   0x3   :  { %16 = vsyncpa [#allocation4], 0 }
   0x4   :  { %17 = vsyncpa [#allocation6], 0  ;;  %s489_s11 = smov [#allocation5]   ;;  %s490_s13 = smov [#allocation3]  }
   0x5   :  { %s44_s12 = sshll.u32 %s489_s11, 4  ;;  %s32_s14 = sshll.u32 %s490_s13, 4  ;;  %s45_s12 = int_to_ptr.vmem [resolvable:$true] %s44_s12  ;;  %s33_s14 = int_to_ptr.vmem [resolvable:$true] %s32_s14 }
   0x6   :  { %s419_s17 = scalar_lea.hbm %s632_s6, 16 }
   0x7   :  { %p420_p0 = scmp.ne.s32.totalorder %s632_s6, %s419_s17  ;;  %p423_p1 = scmp.lt.u32.totalorder %s419_s17, %s632_s6 }
   0x9   :  { %p425_p2 = pnand %p423_p1, %p420_p0 }
   0xb   :  { %428 = shalt.err (!%p425_p2)
}
   0xc   :  { %s429_s8 = scalar_lea.vmem %s45_s12, 16  ;;  %s433_s22 = scalar_lea.vmem %s45_s12, 32 }
   0xd   :  { %p430_p3 = scmp.ne.s32.totalorder %s45_s12, %s429_s8  ;;  %p434_p4 = scmp.lt.s32.totalorder %s45_s12, %s45_s12 }
   0xe   :  { %p435_p5 = scmp.lt.s32.totalorder %s433_s22, %s429_s8 }
  0x10   :  { %p436_p6 = por %p435_p5, %p434_p4 }
  0x12   :  { %p437_p7 = pnand %p436_p6, %p430_p3 }
  0x14   :  { %440 = shalt.err (!%p437_p7)
}
  0x15   :  { %47 = dma.hbm_to_vmem [thread:$0]  %s632_s6, 16, %s45_s12, [#allocation6]  }
  0x16   :  { %s441_s27 = scalar_lea.hbm %s630_s4, 16 }
  0x17   :  { %p442_p8 = scmp.ne.s32.totalorder %s630_s4, %s441_s27  ;;  %p445_p9 = scmp.lt.u32.totalorder %s441_s27, %s630_s4 }
  0x19   :  { %p447_p10 = pnand %p445_p9, %p442_p8 }
  0x1b   :  { %450 = shalt.err (!%p447_p10)
}
  0x1c   :  { %s451_s11 = scalar_lea.vmem %s33_s14, 16  ;;  %s455_s13 = scalar_lea.vmem %s33_s14, 32 }
  0x1d   :  { %p452_p11 = scmp.ne.s32.totalorder %s33_s14, %s451_s11  ;;  %p456_p12 = scmp.lt.s32.totalorder %s33_s14, %s33_s14 }
  0x1e   :  { %p457_p13 = scmp.lt.s32.totalorder %s455_s13, %s451_s11 }
  0x20   :  { %p458_p0 = por %p457_p13, %p456_p12 }
  0x22   :  { %p459_p1 = pnand %p458_p0, %p452_p11 }
  0x24   :  { %462 = shalt.err (!%p459_p1)
}
  0x25   :  { %35 = dma.hbm_to_vmem [thread:$0]  %s630_s4, 16, %s33_s14, [#allocation4]  }
  0x26   :  { %s491_s15 = smov [#allocation7]   ;;  %s463_s19 = scalar_lea.hbm %s633_s7, 16 }
  0x27   :  { %s54_s16 = sshll.u32 %s491_s15, 4  ;;  %p464_p2 = scmp.ne.s32.totalorder %s633_s7, %s463_s19  ;;  %s55_s16 = int_to_ptr.vmem [resolvable:$true] %s54_s16 }
  0x28   :  { %p467_p3 = scmp.lt.u32.totalorder %s463_s19, %s633_s7 }
  0x2a   :  { %p469_p4 = pnand %p467_p3, %p464_p2 }
  0x2c   :  { %472 = shalt.err (!%p469_p4)
}
  0x2d   :  { %s473_s23 = scalar_lea.vmem %s55_s16, 16  ;;  %s477_s4 = scalar_lea.vmem %s55_s16, 32 }
  0x2e   :  { %p474_p5 = scmp.ne.s32.totalorder %s55_s16, %s473_s23  ;;  %p478_p6 = scmp.lt.s32.totalorder %s55_s16, %s55_s16 }
  0x2f   :  { %p479_p7 = scmp.lt.s32.totalorder %s477_s4, %s473_s23 }
  0x31   :  { %p480_p8 = por %p479_p7, %p478_p6 }
  0x33   :  { %p481_p9 = pnand %p480_p8, %p474_p5 }
  0x35   :  { %484 = shalt.err (!%p481_p9)
}
  0x36   :  { %57 = dma.hbm_to_vmem [thread:$0]  %s633_s7, 16, %s55_s16, [#allocation6]  }
  0x37   :  { %485 = dma.done.wait [#allocation4], 16  }
  0x38   :  { %486 = vsyncadd [#allocation4], 4294967280 }
  0x39   :  { %487 = dma.done.wait [#allocation6], 32  }
  0x3a   :  { %488 = vsyncadd [#allocation6], 4294967264  ;;  %v492_v1 = vmov 0.0   ;;  %vm493_vm0 = vmmov 0   ;;  %v494_v2 = vmov 0.0|0.0   ;;  %vm77_vm1 = vcmask 1043456  }
  0x3b   :  { %372 = vmatprep.subr.mxu1 %v492_v1  ;;  %374 = vmatprep.mubr.msk.f32.mxu1 %vm493_vm0, %v492_v1  ;;  %vm73_vm2 = vcmask 31744   ;;  %v72_v3 = vld [vmem:[%s629_s3] sm:$0xf]  ;;  %v235_v7 = vld [vmem:[%s631_s5 + $0x8] sm:$0xff]  ;;  %vm151_vm3 = vcmask 64512   ;;  %v236_v10 = vld [vmem:[%s631_s5 + $0x10] sm:$0xff] }
  0x3c   :  { %401 = vmatprep.subr.bf16.mxu0 %v494_v2  ;;  %398 = vmatprep.mubr.msk.f32.mxu0 %vm493_vm0, %v492_v1  ;;  %v71_v4 = vld [vmem:[%s627_s1] sm:$0xff]  ;;  %v237_v11 = vld [vmem:[%s631_s5 + $0x18] sm:$0xff]  ;;  %v239_v14 = vld [vmem:[%s631_s5 + $0x28] sm:$0xff]  ;;  %vm249_vm4 = vcmask 523264   ;;  %vm343_vm5 = vcmask 7168  }
  0x3d   :  { %v70_v5 = vld [vmem:[%s628_s2] sm:$0xff]  ;;  %373 = vmatpush3.msk.msra.mxu1 %vm77_vm1, %v72_v3  ;;  %v405_v12 = vpack.c.bf16 %v237_v11, %v236_v10  ;;  %v240_v16 = vld [vmem:[%s631_s5 + $0x30] sm:$0xff]  ;;  %v241_v17 = vld [vmem:[%s631_s5 + $0x38] sm:$0xff] }
  0x3e   :  { %v234_v6 = vld [vmem:[%s631_s5] sm:$0xff]  ;;  %375 = vmatmul.mubr.msk.f32.vlgmr.msra.gmra.mrb[0].mxu1 %vm73_vm2, %v71_v4  ;;  %377 = vmatprep.subr.mxu1 %v492_v1  ;;  %v411_v18 = vpack.c.bf16 %v241_v17, %v240_v16 }
  0x3f   :  { %v402_v8 = vpack.c.bf16 %v235_v7, %v234_v6  ;;  %378 = vmatpush3.msra.mxu1 %v70_v5  ;;  %379 = vmatprep.mubr.msk.f32.mxu1 %vm493_vm0, %v492_v1  ;;  %v69_v9 = vld [vmem:[%s626_s0] sm:$0xff] }
  0x40   :  { %v238_v13 = vld [vmem:[%s631_s5 + $0x20] sm:$0xff] }
  0x41   :  { %403 = vmatpush3.bf16.msra.mxu0 %v402_v8  ;;  %v408_v15 = vpack.c.bf16 %v239_v14, %v238_v13  ;;  %v354_v22 = vld [vmem:[#allocation3] ss:$0 sm:$0xff]  ;;  %v355_v27 = vld [vmem:[#allocation5] ss:$0 sm:$0xff]  ;;  %v357_v31 = vld [vmem:[#allocation7] ss:$0 sm:$0xff] }
  0x42   :  { %404 = vmatprep.subr.bf16.mxu0 %v494_v2  ;;  %380 = vmatmul.mubr.msk.f32.vlgmr.msra.gmra.mrb[2].mxu1 %vm151_vm3, %v69_v9  ;;  %v358_v35 = vld [vmem:[#allocation2] ss:$0 sm:$0xff] }
  0x45   :  { %406 = vmatpush3.bf16.msra.mxu0 %v405_v12 }
  0x46   :  { %407 = vmatprep.subr.bf16.mxu0 %v494_v2 }
  0x49   :  { %409 = vmatpush3.bf16.msra.mxu0 %v408_v15 }
  0x4a   :  { %410 = vmatprep.subr.bf16.mxu0 %v494_v2 }
  0x4d   :  { %412 = vmatpush3.bf16.msra.mxu0 %v411_v18 }
 0x111   :  { %v147_v19 = vpop.f32.mrb[0].mxu1 }
 0x112   :  { %v376_v20 = vpop.f32.mrb[1].mxu1 }
 0x115   :  { %v221_v21 = vpop.f32.mrb[2].mxu1 }
 0x116   :  { %v222_v23 = vadd.f32 %v221_v21, %v147_v19  ;;  %v381_v24 = vpop.f32.mrb[3].mxu1 }
 0x118   :  { %v232_v25 = vadd.f32 %v354_v22, %v222_v23 }
 0x11a   :  { %v233_v26 = vmax.f32 %v232_v25, 0.0 }
 0x11c   :  { %399 = vmatmul.mubr.msk.f32.vlgmr.msra.gmra.mrb[0].mxu0 %vm249_vm4, %v233_v26 }
 0x1ef   :  { %v319_v28 = vpop.f32.mrb[0].mxu0 }
 0x1f0   :  { %v320_v29 = vadd.f32 %v355_v27, %v319_v28  ;;  %v400_v30 = vpop.f32.mrb[1].mxu0 }
 0x1f2   :  { %v323_v32 = vmax.f32 %v320_v29, 0.0 }
 0x1f4   :  { %v331_v33 = vmul.f32 %v357_v31, %v323_v32 }
 0x1f6   :  { %v332_v34 = vsel %vm249_vm4, %v331_v33, 0.0 }
 0x1f7   :  { %333 = vadd.xlane.f32.xlu0 %v332_v34 }
 0x284   :  { %v334_v36 = vpop.xlane.xlu0 %333 }
 0x285   :  { %v342_v37 = vadd.f32 %v358_v35, %v334_v36 }
 0x287   :  { %344 = vst.msk [vmem:[%s635_s9] sm:$0xff] %vm343_vm5, %v342_v37 }
 0x288   :  { %349 = vsyncpa [#allocation4], 1 }
 0x289   :  { %350 = vsyncpa [#allocation6], 1 }

</bundles_post_ra>
